<compile_context>
chip_gen: v6e
topology: v6e:2x2x1
jax: 0.10.0
libtpu: 0.0.40
codegen_flags: <defaults>
</compile_context>

<pallas_src>
import jax
import jax.numpy as jnp
from jax.experimental import pallas as pl
from jax.experimental.pallas import tpu as pltpu

HIDDEN = 64


def trpo_critic_kernel(xt_ref, w1t_ref, b1_ref, w2t_ref, b2_ref, w3_ref,
                       b3_ref, out_ref):
    # xt:  (obs_dim, tile_b)   w1t: (H, obs_dim)  b1: (H, 1)
    # w2t: (H, H)              b2:  (H, 1)
    # w3:  (H, 1)              b3:  (1, 1) scalar in SMEM
    # out: (1, tile_b)  -- lane-dense row of values for this batch tile
    xt = xt_ref[...]

    h1 = jnp.tanh(
        jnp.dot(w1t_ref[...], xt, preferred_element_type=jnp.float32)
        + b1_ref[...])
    h2 = jnp.tanh(
        jnp.dot(w2t_ref[...], h1, preferred_element_type=jnp.float32)
        + b2_ref[...])

    # Final (H -> 1) layer: VPU multiply + sublane reduce; result already
    # lane-dense, MXU stays free.
    v = jnp.sum(h2 * w3_ref[...], axis=0, keepdims=True) + b3_ref[0, 0]
    out_ref[...] = v.astype(out_ref.dtype)


def trpo_critic_forward(x, params, *, tile_b=512):
    """x: (B, obs_dim) float.  params: dict w1,b1,w2,b2,w3,b3 (w's are (in, out))."""
    B, obs_dim = x.shape
    w1, b1, w2, b2, w3, b3 = (params[k]
                              for k in ("w1", "b1", "w2", "b2", "w3", "b3"))
    H = w1.shape[1]

    # Batch tile: multiple of 128 lanes, but don't over-pad tiny batches.
    tile_b = max(128, min(tile_b, 128 * pl.cdiv(B, 128)))
    num_tiles = pl.cdiv(B, tile_b)
    b_pad = num_tiles * tile_b

    # Transposed activations: batch lives on the lane axis. Remainder rows are
    # zero-padded and dropped after the call.
    xt = jnp.pad(x.astype(jnp.float32).T, ((0, 0), (0, b_pad - B)))
    w1t = w1.T                      # (H, obs_dim)
    w2t = w2.T                      # (H, H)
    b1c = b1.reshape(H, 1)
    b2c = b2.reshape(H, 1)
    w3c = w3.reshape(H, 1)
    b3s = b3.reshape(1, 1)

    in_specs = [
        pl.BlockSpec((obs_dim, tile_b), lambda i: (0, i)),   # x^T batch tile
        pl.BlockSpec((H, obs_dim), lambda i: (0, 0)),        # w1^T (resident)
        pl.BlockSpec((H, 1), lambda i: (0, 0)),              # b1
        pl.BlockSpec((H, H), lambda i: (0, 0)),              # w2^T
        pl.BlockSpec((H, 1), lambda i: (0, 0)),              # b2
        pl.BlockSpec((H, 1), lambda i: (0, 0)),              # w3
        pl.BlockSpec(memory_space=pltpu.MemorySpace.SMEM),   # b3 scalar
    ]
    out_spec = pl.BlockSpec((1, tile_b), lambda i: (0, i))

    out = pl.pallas_call(
        trpo_critic_kernel,
        out_shape=jax.ShapeDtypeStruct((1, b_pad), jnp.float32),
        grid=(num_tiles,),
        in_specs=in_specs,
        out_specs=out_spec,
        compiler_params=pltpu.CompilerParams(
            dimension_semantics=("parallel",)),
    )(xt, w1t, b1c, w2t, b2c, w3c, b3s)

    return out[0, :B].reshape(B, 1)


def init_params(key, obs_dim, hidden=HIDDEN):
    """Deterministic synthetic parameters (shapes match the nn.Linear layers)."""
    k1, k2, k3, k4, k5, k6 = jax.random.split(key, 6)
    s1 = 1.0 / jnp.sqrt(obs_dim)
    s2 = 1.0 / jnp.sqrt(hidden)
    return {
        "w1": jax.random.uniform(k1, (obs_dim, hidden), jnp.float32, -s1, s1),
        "b1": jax.random.uniform(k2, (1, hidden), jnp.float32, -s1, s1),
        "w2": jax.random.uniform(k3, (hidden, hidden), jnp.float32, -s2, s2),
        "b2": jax.random.uniform(k4, (1, hidden), jnp.float32, -s2, s2),
        "w3": jax.random.uniform(k5, (hidden, 1), jnp.float32, -s2, s2),
        "b3": jax.random.uniform(k6, (1, 1), jnp.float32, -s2, s2),
    }


def reference_forward(x, p):
    h1 = jnp.tanh(x @ p["w1"] + p["b1"])
    h2 = jnp.tanh(h1 @ p["w2"] + p["b2"])
    return h2 @ p["w3"] + p["b3"]


if __name__ == "__main__":
    key = jax.random.PRNGKey(0)
    k_params, k_x1, k_x2 = jax.random.split(key, 3)

    obs_dim = 16
    params = init_params(k_params, obs_dim)

    # Small batch (exercises the clamped 128-lane tile + zero padding).
    B1 = 8
    x1 = jax.random.normal(k_x1, (B1, obs_dim), jnp.float32)
    out1 = jax.block_until_ready(trpo_critic_forward(x1, params))
    ref1 = reference_forward(x1, params)
    assert out1.shape == (B1, 1)
    assert jnp.allclose(out1, ref1, atol=1e-5, rtol=1e-5), "mismatch (B=8)"

    # Non-multiple-of-128 batch (exercises remainder padding path).
    B2 = 200
    x2 = jax.random.normal(k_x2, (B2, obs_dim), jnp.float32)
    out2 = jax.block_until_ready(trpo_critic_forward(x2, params))
    ref2 = reference_forward(x2, params)
    assert out2.shape == (B2, 1)
    assert jnp.allclose(out2, ref2, atol=1e-5, rtol=1e-5), "mismatch (B=200)"

    print("KERNEL_OK")
</pallas_src>

<mosaic_0001>
module attributes {stable_mosaic.version = 11 : i64} {
  func.func @trpo_critic_kernel(%arg0: i32, %arg1: memref<16x128xf32, #tpu.memory_space<vmem>>, %arg2: memref<64x16xf32, #tpu.memory_space<vmem>>, %arg3: memref<64x1xf32, #tpu.memory_space<vmem>>, %arg4: memref<64x64xf32, #tpu.memory_space<vmem>>, %arg5: memref<64x1xf32, #tpu.memory_space<vmem>>, %arg6: memref<64x1xf32, #tpu.memory_space<vmem>>, %arg7: memref<1x1xf32, #tpu.memory_space<smem>>, %arg8: memref<1x128xf32, #tpu.memory_space<vmem>>) attributes {dimension_semantics = [#tpu.dimension_semantics<parallel>], iteration_bounds = array<i64: 1>, scalar_prefetch = 0 : i64, scratch_operands = 0 : i64, tpu.core_type = #tpu.core_type<tc>, window_params = [{transform_indices = @transform_0, window_bounds = array<i64: 16, 128>}, {pipeline_mode = #tpu.pipeline_mode<synchronous>, transform_indices = @transform_1, window_bounds = array<i64: 64, 16>}, {pipeline_mode = #tpu.pipeline_mode<synchronous>, transform_indices = @transform_2, window_bounds = array<i64: 64, 1>}, {pipeline_mode = #tpu.pipeline_mode<synchronous>, transform_indices = @transform_3, window_bounds = array<i64: 64, 64>}, {pipeline_mode = #tpu.pipeline_mode<synchronous>, transform_indices = @transform_4, window_bounds = array<i64: 64, 1>}, {pipeline_mode = #tpu.pipeline_mode<synchronous>, transform_indices = @transform_5, window_bounds = array<i64: 64, 1>}, {transform_indices = @transform_6, window_bounds = array<i64: 1, 1>}, {transform_indices = @transform_7, window_bounds = array<i64: 1, 128>}]} {
    %c0 = arith.constant 0 : index
    %c0_0 = arith.constant 0 : index
    %0 = vector.load %arg1[%c0, %c0_0] : memref<16x128xf32, #tpu.memory_space<vmem>>, vector<16x128xf32>
    %c0_1 = arith.constant 0 : index
    %c0_2 = arith.constant 0 : index
    %1 = vector.load %arg2[%c0_1, %c0_2] : memref<64x16xf32, #tpu.memory_space<vmem>>, vector<64x16xf32>
    %cst = arith.constant dense<0.000000e+00> : vector<64x128xf32>
    %2 = tpu.matmul %1, %0, %cst {dimension_numbers = #tpu.dot_dimension_numbers<[1], [0], [0], [1], [0, 0, 1, 1], [], []>} : vector<64x16xf32>, vector<16x128xf32>, vector<64x128xf32> -> vector<64x128xf32>
    %c0_3 = arith.constant 0 : index
    %c0_4 = arith.constant 0 : index
    %3 = vector.load %arg3[%c0_3, %c0_4] : memref<64x1xf32, #tpu.memory_space<vmem>>, vector<64x1xf32>
    %4 = vector.broadcast %3 : vector<64x1xf32> to vector<64x128xf32>
    %5 = arith.addf %2, %4 : vector<64x128xf32>
    %6 = math.tanh %5 : vector<64x128xf32>
    %c0_5 = arith.constant 0 : index
    %c0_6 = arith.constant 0 : index
    %7 = vector.load %arg4[%c0_5, %c0_6] : memref<64x64xf32, #tpu.memory_space<vmem>>, vector<64x64xf32>
    %cst_7 = arith.constant dense<0.000000e+00> : vector<64x128xf32>
    %8 = tpu.matmul %7, %6, %cst_7 {dimension_numbers = #tpu.dot_dimension_numbers<[1], [0], [0], [1], [0, 0, 1, 1], [], []>} : vector<64x64xf32>, vector<64x128xf32>, vector<64x128xf32> -> vector<64x128xf32>
    %c0_8 = arith.constant 0 : index
    %c0_9 = arith.constant 0 : index
    %9 = vector.load %arg5[%c0_8, %c0_9] : memref<64x1xf32, #tpu.memory_space<vmem>>, vector<64x1xf32>
    %10 = vector.broadcast %9 : vector<64x1xf32> to vector<64x128xf32>
    %11 = arith.addf %8, %10 : vector<64x128xf32>
    %12 = math.tanh %11 : vector<64x128xf32>
    %c0_10 = arith.constant 0 : index
    %c0_11 = arith.constant 0 : index
    %13 = vector.load %arg6[%c0_10, %c0_11] : memref<64x1xf32, #tpu.memory_space<vmem>>, vector<64x1xf32>
    %14 = vector.broadcast %13 : vector<64x1xf32> to vector<64x128xf32>
    %15 = arith.mulf %12, %14 : vector<64x128xf32>
    %cst_12 = arith.constant dense<0.000000e+00> : vector<128xf32>
    %16 = vector.multi_reduction <add>, %15, %cst_12 [0] : vector<64x128xf32> to vector<128xf32>
    %17 = vector.shape_cast %16 : vector<128xf32> to vector<1x128xf32>
    %c0_13 = arith.constant 0 : index
    %c0_14 = arith.constant 0 : index
    %18 = memref.load %arg7[%c0_13, %c0_14] : memref<1x1xf32, #tpu.memory_space<smem>>
    %19 = vector.broadcast %18 : f32 to vector<1x128xf32>
    %20 = arith.addf %17, %19 : vector<1x128xf32>
    %c0_15 = arith.constant 0 : index
    %c0_16 = arith.constant 0 : index
    %21 = vector.load %arg8[%c0_15, %c0_16] : memref<1x128xf32, #tpu.memory_space<vmem>>, vector<1x128xf32>
    tpu.vector_store %arg8[%c0_15, %c0_16], %20 {strides = array<i32>} : memref<1x128xf32, #tpu.memory_space<vmem>>, vector<1x128xf32>,
    return
  }
  func.func @transform_0(%arg0: i32) -> (i32, i32) {
    %c0_i32 = arith.constant 0 : i32
    %c0_i32_0 = arith.constant 0 : i32
    return %c0_i32, %arg0 : i32, i32
  }
  func.func @transform_1(%arg0: i32) -> (i32, i32) {
    %c0_i32 = arith.constant 0 : i32
    %c0_i32_0 = arith.constant 0 : i32
    %c0_i32_1 = arith.constant 0 : i32
    return %c0_i32, %c0_i32_0 : i32, i32
  }
  func.func @transform_2(%arg0: i32) -> (i32, i32) {
    %c0_i32 = arith.constant 0 : i32
    %c0_i32_0 = arith.constant 0 : i32
    %c0_i32_1 = arith.constant 0 : i32
    return %c0_i32, %c0_i32_0 : i32, i32
  }
  func.func @transform_3(%arg0: i32) -> (i32, i32) {
    %c0_i32 = arith.constant 0 : i32
    %c0_i32_0 = arith.constant 0 : i32
    %c0_i32_1 = arith.constant 0 : i32
    return %c0_i32, %c0_i32_0 : i32, i32
  }
  func.func @transform_4(%arg0: i32) -> (i32, i32) {
    %c0_i32 = arith.constant 0 : i32
    %c0_i32_0 = arith.constant 0 : i32
    %c0_i32_1 = arith.constant 0 : i32
    return %c0_i32, %c0_i32_0 : i32, i32
  }
  func.func @transform_5(%arg0: i32) -> (i32, i32) {
    %c0_i32 = arith.constant 0 : i32
    %c0_i32_0 = arith.constant 0 : i32
    %c0_i32_1 = arith.constant 0 : i32
    return %c0_i32, %c0_i32_0 : i32, i32
  }
  func.func @transform_6(%arg0: i32) -> (i32, i32) {
    %c0_i32 = arith.constant 0 : i32
    %c0_i32_0 = arith.constant 0 : i32
    %c0_i32_1 = arith.constant 0 : i32
    return %c0_i32, %c0_i32_0 : i32, i32
  }
  func.func @transform_7(%arg0: i32) -> (i32, i32) {
    %c0_i32 = arith.constant 0 : i32
    %c0_i32_0 = arith.constant 0 : i32
    return %c0_i32, %arg0 : i32, i32
  }
}

</mosaic_0001>

<bundles_post_ra>
// kernel: tpu_custom_call.1
= control target key start
LH: loop header
LB: loop body
LE: loop exit
PB: predicated region body
PF: predicated region fallthrough
CT: control target
= control target key end

     0   :  { %vm86_vm0 = vcmask 130048   ;;  %v665_v4 = vmov 0   ;;  %s855_s0 = inlined_call_operand.vmem [shape: f32[16,128], index: 0, kind: input, shape index: {}]   ;;  %s856_s1 = inlined_call_operand.vmem [shape: f32[64,16], index: 1, kind: input, shape index: {}]   ;;  %s857_s2 = inlined_call_operand.vmem [shape: f32[64,1], index: 2, kind: input, shape index: {}]   ;;  %s858_s3 = inlined_call_operand.vmem [shape: f32[64,64], index: 3, kind: input, shape index: {}]   ;;  %s859_s4 = inlined_call_operand.vmem [shape: f32[64,1], index: 4, kind: input, shape index: {}]   ;;  %s860_s5 = inlined_call_operand.vmem [shape: f32[64,1], index: 5, kind: input, shape index: {}]   ;;  %s861_s6 = inlined_call_operand.<no memory space> [shape: f32[1,1], index: 6, kind: input, shape index: {}]   ;;  %s862_s7 = inlined_call_operand.hbm [shape: f32[1,128], index: 7, kind: output, shape index: {}]  }
   0x1   :  { %v29_v0 = vld [vmem:[%s855_s0 + $0x8] sm:$0xff]  ;;  %v28_v1 = vld [vmem:[%s855_s0] sm:$0xff]  ;;  %609 = vset.pattern.permute.xlu0 %v665_v4  ;;  %v32_v5 = vld [vmem:[%s856_s1 + $0x10] sm:$0xff]  ;;  %610 = vset.pattern.permute.xlu1 %v665_v4 }
   0x2   :  { %v30_v2 = vld [vmem:[%s856_s1] sm:$0xff]  ;;  %547 = vmatprep.subr.mxu0 %v29_v0  ;;  %v31_v3 = vld [vmem:[%s856_s1 + $0x8] sm:$0xff]  ;;  %v45_v6 = vld [vmem:[%s857_s2 + $0x38] sm:$0xff] }
   0x3   :  { %551 = vmatprep.mubr.msk.f32.mxu0 %vm86_vm0, %v30_v2  ;;  %548 = vmatpush3.msra.mxu0 %v29_v0  ;;  %v43_v7 = vld [vmem:[%s857_s2 + $0x28] sm:$0xff]  ;;  %v44_v8 = vld [vmem:[%s857_s2 + $0x30] sm:$0xff]  ;;  %v33_v9 = vld [vmem:[%s856_s1 + $0x18] sm:$0xff] }
   0x4   :  { %549 = vmatprep.subr.mxu0 %v28_v1  ;;  %83 = vperm.xlu0 %609, %v45_v6   ;;  %v42_v10 = vld [vmem:[%s857_s2 + $0x20] sm:$0xff]  ;;  %v41_v12 = vld [vmem:[%s857_s2 + $0x18] sm:$0xff]  ;;  %v35_v13 = vld [vmem:[%s856_s1 + $0x28] sm:$0xff] }
   0x5   :  { %550 = vmatpush3.msra.mxu0 %v28_v1  ;;  %73 = vperm.xlu1 %610, %v43_v7   ;;  %v34_v11 = vld [vmem:[%s856_s1 + $0x20] sm:$0xff]  ;;  %v40_v14 = vld [vmem:[%s857_s2 + $0x10] sm:$0xff] }
   0x6   :  { %552 = vmatmul.mubr.msk.f32.vlgmr.msra.gmra.mxu0 %vm86_vm0, %v31_v3  ;;  %v36_v15 = vld [vmem:[%s856_s1 + $0x30] sm:$0xff] }
   0x7   :  { %554 = vmatprep.mubr.msk.f32.mxu0 %vm86_vm0, %v32_v5 }
   0x8   :  { %78 = vperm.xlu0 %609, %v44_v8  }
   0x9   :  { %68 = vperm.xlu1 %610, %v42_v10  }
   0xa   :  { %555 = vmatmul.mubr.msk.f32.gmra.mxu0 %vm86_vm0, %v33_v9 }
   0xb   :  { %557 = vmatprep.mubr.msk.f32.mxu0 %vm86_vm0, %v34_v11 }
   0xc   :  { %13 = vsyncpa [#allocation4], 0  ;;  %63 = vperm.xlu0 %609, %v41_v12   ;;  %v39_v16 = vld [vmem:[%s857_s2 + $0x8] sm:$0xff]  ;;  %v37_v17 = vld [vmem:[%s856_s1 + $0x38] sm:$0xff]  ;;  %vm280_vm1 = vcmask 523264   ;;  %s666_s8 = smov [#allocation3]  }
   0xd   :  { %58 = vperm.xlu1 %610, %v40_v14   ;;  %v38_v18 = vld [vmem:[%s857_s2] sm:$0xff]  ;;  %v233_v20 = vld [vmem:[%s859_s4 + $0x8] sm:$0xff]  ;;  %v234_v21 = vld [vmem:[%s859_s4 + $0x10] sm:$0xff]  ;;  %s497_s9 = sshll.u32 %s666_s8, 4  ;;  %s498_s9 = int_to_ptr.vmem [resolvable:$true] %s497_s9 }
   0xe   :  { %558 = vmatmul.mubr.msk.f32.gmra.mxu0 %vm86_vm0, %v35_v13  ;;  %v232_v19 = vld [vmem:[%s859_s4] sm:$0xff]  ;;  %v235_v22 = vld [vmem:[%s859_s4 + $0x18] sm:$0xff]  ;;  %v237_v24 = vld [vmem:[%s859_s4 + $0x28] sm:$0xff]  ;;  %s643_s10 = scalar_lea.vmem %s498_s9, 16  ;;  %p648_p1 = scmp.lt.s32.totalorder %s498_s9, %s498_s9 }
   0xf   :  { %560 = vmatprep.mubr.msk.f32.mxu0 %vm86_vm0, %v36_v15  ;;  %v236_v23 = vld [vmem:[%s859_s4 + $0x20] sm:$0xff]  ;;  %v238_v25 = vld [vmem:[%s859_s4 + $0x30] sm:$0xff]  ;;  %v239_v26 = vld [vmem:[%s859_s4 + $0x38] sm:$0xff]  ;;  %p644_p0 = scmp.ne.s32.totalorder %s498_s9, %s643_s10  ;;  %s647_s4 = scalar_lea.vmem %s498_s9, 32 }
  0x10   :  { %53 = vperm.xlu0 %609, %v39_v16   ;;  %v418_v27 = vld [vmem:[%s860_s5] sm:$0xff]  ;;  %v419_v28 = vld [vmem:[%s860_s5 + $0x8] sm:$0xff]  ;;  %v420_v29 = vld [vmem:[%s860_s5 + $0x10] sm:$0xff]  ;;  %p649_p2 = scmp.lt.s32.totalorder %s647_s4, %s643_s10 }
  0x11   :  { %48 = vperm.xlu1 %610, %v38_v18   ;;  %v421_v30 = vld [vmem:[%s860_s5 + $0x18] sm:$0xff]  ;;  %v422_v31 = vld [vmem:[%s860_s5 + $0x20] sm:$0xff]  ;;  %v423_v32 = vld [vmem:[%s860_s5 + $0x28] sm:$0xff] }
  0x12   :  { %561 = vmatmul.mubr.msk.f32.gmra.mxu0 %vm86_vm0, %v37_v17  ;;  %v424_v33 = vld [vmem:[%s860_s5 + $0x30] sm:$0xff]  ;;  %v425_v34 = vld [vmem:[%s860_s5 + $0x38] sm:$0xff]  ;;  %v224_v35 = vld [vmem:[%s858_s3] sm:$0xff]  ;;  %p650_p3 = por %p649_p2, %p648_p1 }
  0x13   :  { %v226_v36 = vld [vmem:[%s858_s3 + $0x10] sm:$0xff]  ;;  %579 = vmatprep.mubr.msk.f32.mxu0 %vm280_vm1, %v224_v35  ;;  %v225_v5 = vld [vmem:[%s858_s3 + $0x8] sm:$0xff]  ;;  %v227_v6 = vld [vmem:[%s858_s3 + $0x18] sm:$0xff] }
  0x14   :  { %242 = vperm.xlu0 %609, %v232_v19   ;;  %582 = vmatprep.mubr.msk.f32.mxu1 %vm280_vm1, %v226_v36  ;;  %v228_v7 = vld [vmem:[%s858_s3 + $0x20] sm:$0xff]  ;;  %v229_v8 = vld [vmem:[%s858_s3 + $0x28] sm:$0xff]  ;;  %v230_v9 = vld [vmem:[%s858_s3 + $0x30] sm:$0xff]  ;;  %p651_p4 = pnand %p650_p3, %p644_p0 }
  0x15   :  { %247 = vperm.xlu1 %610, %v233_v20   ;;  %v231_v10 = vld [vmem:[%s858_s3 + $0x38] sm:$0xff] }
  0x18   :  { %252 = vperm.xlu0 %609, %v234_v21  }
  0x19   :  { %257 = vperm.xlu1 %610, %v235_v22  }
  0x1c   :  { %262 = vperm.xlu0 %609, %v236_v23  }
  0x1d   :  { %267 = vperm.xlu1 %610, %v237_v24  }
  0x20   :  { %272 = vperm.xlu0 %609, %v238_v25  }
  0x21   :  { %277 = vperm.xlu1 %610, %v239_v26  }
  0x24   :  { %428 = vperm.xlu0 %609, %v418_v27  }
  0x25   :  { %433 = vperm.xlu1 %610, %v419_v28  }
  0x28   :  { %438 = vperm.xlu0 %609, %v420_v29  }
  0x29   :  { %443 = vperm.xlu1 %610, %v421_v30  }
  0x2c   :  { %448 = vperm.xlu0 %609, %v422_v31  }
  0x2d   :  { %453 = vperm.xlu1 %610, %v423_v32  }
  0x30   :  { %458 = vperm.xlu0 %609, %v424_v33  }
  0x31   :  { %463 = vperm.xlu1 %610, %v425_v34  }
  0x7f   :  { %v84_v39 = vpop.permute.xlu0 %83 }
  0x80   :  { %v74_v41 = vpop.permute.xlu1 %73 }
  0x83   :  { %v79_v44 = vpop.permute.xlu0 %78 }
  0x84   :  { %v69_v46 = vpop.permute.xlu1 %68 }
  0x87   :  { %v64_v52 = vpop.permute.xlu0 %63 }
  0x88   :  { %v59_v54 = vpop.permute.xlu1 %58 }
  0x8b   :  { %v54_v57 = vpop.permute.xlu0 %53 }
  0x8c   :  { %v49_v59 = vpop.permute.xlu1 %48 }
  0x8f   :  { %v243_v11 = vpop.permute.xlu0 %242 }
  0x90   :  { %v248_v12 = vpop.permute.xlu1 %247 }
  0x93   :  { %v253_v13 = vpop.permute.xlu0 %252 }
  0x94   :  { %v258_v14 = vpop.permute.xlu1 %257 }
  0x97   :  { %v263_v15 = vpop.permute.xlu0 %262 }
  0x98   :  { %v268_v16 = vpop.permute.xlu1 %267 }
  0x9b   :  { %v273_v25 = vpop.permute.xlu0 %272 }
  0x9c   :  { %v278_v27 = vpop.permute.xlu1 %277 }
  0x9f   :  { %v429_v32 = vpop.permute.xlu0 %428 }
  0xa0   :  { %v434_v36 = vpop.permute.xlu1 %433 }
  0xc6   :  { %v553_v37 = vpop.f32.mrf.mxu0 }
  0xc7   :  { %v183_v58 = vadd.f32 %v553_v37, %v54_v57 }
  0xc8   :  { %v177_v38 = vpop.f32.mrf.mxu0 }
  0xc9   :  { %v178_v60 = vadd.f32 %v177_v38, %v49_v59  ;;  %v439_v38 = vpop.permute.xlu0 %438 }
  0xca   :  { %v556_v40 = vpop.f32.mrf.mxu0 }
  0xcb   :  { %v193_v55 = vadd.f32 %v556_v40, %v64_v52  ;;  %v444_v40 = vpop.permute.xlu1 %443 }
  0xcc   :  { %v187_v42 = vpop.f32.mrf.mxu0 }
  0xcd   :  { %v188_v56 = vadd.f32 %v187_v42, %v59_v54 }
  0xce   :  { %v559_v43 = vpop.f32.mrf.mxu0 }
  0xcf   :  { %v203_v50 = vadd.f32 %v559_v43, %v74_v41  ;;  %v454_v52 = vpop.permute.xlu1 %453 }
  0xd0   :  { %v197_v45 = vpop.f32.mrf.mxu0 }
  0xd1   :  { %v198_v53 = vadd.f32 %v197_v45, %v69_v46 }
  0xd2   :  { %v562_v47 = vpop.f32.mrf.mxu0 }
  0xd3   :  { %v213_v48 = vadd.f32 %v562_v47, %v84_v39 }
  0xd4   :  { %v207_v49 = vpop.f32.mrf.mxu0 }
  0xd5   :  { %611 = vtanh.f32 %v213_v48  ;;  %v208_v51 = vadd.f32 %v207_v49, %v79_v44  ;;  %v449_v48 = vpop.permute.xlu0 %448 }
  0xd7   :  { %613 = vtanh.f32 %v208_v51 }
  0xd8   :  { %615 = vtanh.f32 %v203_v50 }
  0xd9   :  { %617 = vtanh.f32 %v198_v53  ;;  %v459_v59 = vpop.permute.xlu0 %458 }
  0xda   :  { %619 = vtanh.f32 %v193_v55 }
  0xdb   :  { %621 = vtanh.f32 %v188_v56 }
  0xdc   :  { %623 = vtanh.f32 %v183_v58 }
  0xdd   :  { %625 = vtanh.f32 %v178_v60 }
  0xe2   :  { %v612_v61 = vpop.eup %611 }
  0xe3   :  { %563 = vmatprep.subr.mxu0 %v612_v61  ;;  %591 = vmatprep.subr.mxu1 %v612_v61 }
  0xe4   :  { %v614_v62 = vpop.eup %613  ;;  %564 = vmatpush3.msra.mxu0 %v612_v61  ;;  %599 = vmatpush3.msra.mxu1 %v612_v61 }
  0xe5   :  { %565 = vmatprep.subr.mxu0 %v614_v62  ;;  %592 = vmatprep.subr.mxu1 %v614_v62  ;;  %v616_v63 = vpop.eup %615 }
  0xe6   :  { %566 = vmatpush3.msra.mxu0 %v614_v62  ;;  %600 = vmatpush3.msra.mxu1 %v614_v62  ;;  %v618_v0 = vpop.eup %617  ;;  %v464_v62 = vpop.permute.xlu1 %463 }
  0xe7   :  { %567 = vmatprep.subr.mxu0 %v616_v63  ;;  %593 = vmatprep.subr.mxu1 %v616_v63  ;;  %v620_v1 = vpop.eup %619 }
  0xe8   :  { %568 = vmatpush3.msra.mxu0 %v616_v63  ;;  %601 = vmatpush3.msra.mxu1 %v616_v63  ;;  %v622_v2 = vpop.eup %621 }
  0xe9   :  { %569 = vmatprep.subr.mxu0 %v618_v0  ;;  %594 = vmatprep.subr.mxu1 %v618_v0  ;;  %v624_v3 = vpop.eup %623 }
  0xea   :  { %570 = vmatpush3.msra.mxu0 %v618_v0  ;;  %602 = vmatpush3.msra.mxu1 %v618_v0  ;;  %v626_v4 = vpop.eup %625 }
  0xeb   :  { %571 = vmatprep.subr.mxu0 %v620_v1  ;;  %595 = vmatprep.subr.mxu1 %v620_v1 }
  0xec   :  { %572 = vmatpush3.msra.mxu0 %v620_v1  ;;  %603 = vmatpush3.msra.mxu1 %v620_v1 }
  0xed   :  { %573 = vmatprep.subr.mxu0 %v622_v2  ;;  %596 = vmatprep.subr.mxu1 %v622_v2 }
  0xee   :  { %574 = vmatpush3.msra.mxu0 %v622_v2  ;;  %604 = vmatpush3.msra.mxu1 %v622_v2 }
  0xef   :  { %575 = vmatprep.subr.mxu0 %v624_v3  ;;  %597 = vmatprep.subr.mxu1 %v624_v3 }
  0xf0   :  { %576 = vmatpush3.msra.mxu0 %v624_v3  ;;  %605 = vmatpush3.msra.mxu1 %v624_v3 }
  0xf1   :  { %577 = vmatprep.subr.mxu0 %v626_v4  ;;  %598 = vmatprep.subr.mxu1 %v626_v4 }
  0xf2   :  { %578 = vmatpush3.msra.mxu0 %v626_v4  ;;  %606 = vmatpush3.msra.mxu1 %v626_v4 }
  0xf3   :  { %580 = vmatmul.mubr.msk.f32.vlgmr.msra.gmra.mxu0 %vm280_vm1, %v225_v5  ;;  %583 = vmatmul.mubr.msk.f32.vlgmr.msra.gmra.mxu1 %vm280_vm1, %v227_v6 }
  0xf4   :  { %585 = vmatprep.mubr.msk.f32.mxu1 %vm280_vm1, %v228_v7  ;;  %v488_v7 = vstv %s861_s6 }
  0xf7   :  { %586 = vmatmul.mubr.msk.f32.gmra.mxu1 %vm280_vm1, %v229_v8 }
  0xf8   :  { %588 = vmatprep.mubr.msk.f32.mxu1 %vm280_vm1, %v230_v9 }
  0xfb   :  { %589 = vmatmul.mubr.msk.f32.gmra.mxu1 %vm280_vm1, %v231_v10 }
 0x1b3   :  { %v581_v17 = vpop.f32.mrf.mxu0  ;;  %v584_v18 = vpop.f32.mrf.mxu1 }
 0x1b4   :  { %v377_v19 = vadd.f32 %v581_v17, %v248_v12  ;;  %v387_v22 = vadd.f32 %v584_v18, %v258_v14 }
 0x1b5   :  { %v371_v20 = vpop.f32.mrf.mxu0  ;;  %v381_v21 = vpop.f32.mrf.mxu1 }
 0x1b6   :  { %627 = vtanh.f32 %v377_v19  ;;  %v372_v23 = vadd.f32 %v371_v20, %v243_v11  ;;  %v382_v24 = vadd.f32 %v381_v21, %v253_v13 }
 0x1b7   :  { %v587_v26 = vpop.f32.mrf.mxu1 }
 0x1b8   :  { %629 = vtanh.f32 %v372_v23  ;;  %v397_v29 = vadd.f32 %v587_v26, %v268_v16 }
 0x1b9   :  { %631 = vtanh.f32 %v382_v24  ;;  %v391_v28 = vpop.f32.mrf.mxu1 }
 0x1ba   :  { %633 = vtanh.f32 %v387_v22  ;;  %v392_v30 = vadd.f32 %v391_v28, %v263_v15 }
 0x1bb   :  { %v590_v31 = vpop.f32.mrf.mxu1 }
 0x1bc   :  { %635 = vtanh.f32 %v392_v30  ;;  %v407_v34 = vadd.f32 %v590_v31, %v278_v27 }
 0x1bd   :  { %v401_v33 = vpop.f32.mrf.mxu1  ;;  %637 = vtanh.f32 %v397_v29 }
 0x1be   :  { %v402_v35 = vadd.f32 %v401_v33, %v273_v25 }
 0x1c0   :  { %639 = vtanh.f32 %v402_v35 }
 0x1c1   :  { %641 = vtanh.f32 %v407_v34 }
 0x1c3   :  { %v628_v37 = vpop.eup %627 }
 0x1c4   :  { %v467_v42 = vmul.f32 %v628_v37, %v434_v36 }
 0x1c5   :  { %v630_v39 = vpop.eup %629 }
 0x1c6   :  { %v632_v41 = vpop.eup %631  ;;  %v466_v43 = vmul.f32 %v630_v39, %v429_v32 }
 0x1c7   :  { %v634_v44 = vpop.eup %633  ;;  %v468_v46 = vmul.f32 %v632_v41, %v439_v38 }
 0x1c8   :  { %v474_v45 = vadd.f32 %v467_v42, %v466_v43  ;;  %v469_v49 = vmul.f32 %v634_v44, %v444_v40 }
 0x1c9   :  { %v636_v47 = vpop.eup %635 }
 0x1ca   :  { %v475_v50 = vadd.f32 %v474_v45, %v468_v46  ;;  %v638_v51 = vpop.eup %637  ;;  %v470_v53 = vmul.f32 %v636_v47, %v449_v48 }
 0x1cb   :  { %v471_v56 = vmul.f32 %v638_v51, %v454_v52 }
 0x1cc   :  { %v476_v54 = vadd.f32 %v475_v50, %v469_v49 }
 0x1cd   :  { %v640_v55 = vpop.eup %639 }
 0x1ce   :  { %v477_v57 = vadd.f32 %v476_v54, %v470_v53  ;;  %v642_v58 = vpop.eup %641  ;;  %v472_v60 = vmul.f32 %v640_v55, %v459_v59 }
 0x1cf   :  { %v473_v63 = vmul.f32 %v642_v58, %v464_v62 }
 0x1d0   :  { %v478_v61 = vadd.f32 %v477_v57, %v471_v56 }
 0x1d2   :  { %v479_v0 = vadd.f32 %v478_v61, %v472_v60 }
 0x1d4   :  { %v480_v1 = vadd.f32 %v479_v0, %v473_v63 }
 0x1d6   :  { %v481_v2 = vrot.slane %v480_v1, 4 }
 0x1d8   :  { %v482_v3 = vadd.f32 %v481_v2, %v480_v1 }
 0x1da   :  { %v483_v4 = vrot.slane %v482_v3, 2 }
 0x1dc   :  { %v484_v5 = vadd.f32 %v483_v4, %v482_v3 }
 0x1de   :  { %v485_v6 = vrot.slane %v484_v5, 1 }
 0x1e0   :  { %v486_v8 = vadd.f32 %v485_v6, %v484_v5 }
 0x1e2   :  { %v489_v9 = vadd.f32 %v488_v7, %v486_v8 }
 0x1e4   :  { %490 = vst [vmem:[#allocation3] sm:$0x1] %v489_v9 }
 0x1e5   :  { %654 = shalt.err (!%p651_p4)
}
 0x1e6   :  { %500 = dma.vmem_to_hbm [thread:$0]  %s498_s9, 16, %s862_s7, [#allocation4]  }
 0x1e7   :  { %663 = dma.done.wait [#allocation4], 16  }
 0x1e8   :  { %664 = vsyncadd [#allocation4], 4294967280 }
 0x1e9   :  { %504 = vsyncpa [#allocation4], 1 }

</bundles_post_ra>
